<compile_context>
chip_gen: v5e
topology: v5e:2x2
jax: 0.10.0
libtpu: 0.0.40
codegen_flags: <defaults>
</compile_context>

<pallas_src>
import functools
import math

import jax
import jax.numpy as jnp
from jax import lax
from jax.experimental import pallas as pl
from jax.experimental.pallas import tpu as pltpu

EMBED_DIM = 32
N_HEADS = 8
EXPANSION = 4
HEAD_DIM = EMBED_DIM // N_HEADS
FF_DIM = EXPANSION * EMBED_DIM
LN_EPS = 1e-5


def _layer_norm(x, gamma, beta):
    # one-pass statistics: var = E[x^2] - mean^2 (halves cross-lane reductions)
    mean = jnp.mean(x, axis=-1, keepdims=True)
    mean_sq = jnp.mean(x * x, axis=-1, keepdims=True)
    var = mean_sq - mean * mean
    return (x - mean) * lax.rsqrt(var + LN_EPS) * gamma + beta


def encoder_block_kernel(k_ref, q_ref, v_ref, w_ee_ref, w1t_ref, w2t_ref,
                         rep_ref, hmask_t_ref, hmask_ref, vecs_ref, bf1_ref,
                         out_ref, *, n_heads, seq):
    S = seq
    k_in = k_ref[0]                       # (S, E)
    q_in = q_ref[0]                       # (S, E)
    v_in = v_ref[0]                       # (S, E)
    E = q_in.shape[-1]

    a_blk = w_ee_ref[0]                   # (E, E)  blockdiag(Wq^T Wk / sqrt(d))
    w_vo = w_ee_ref[1]                    # (E, E)  blockdiag(Wv^T) @ Wo^T

    # ---- attention scores, transposed layout: keys on sublanes, (head,query) on lanes
    m = jnp.dot(q_in, a_blk, preferred_element_type=jnp.float32)        # (S, E)
    # m_exp[e, h*S + n] = m[n, e]: transpose + per-head replication in one MXU pass
    m_exp = lax.dot_general(m, rep_ref[...], (((0,), (0,)), ((), ())),
                            preferred_element_type=jnp.float32)         # (E, H*S)
    m_exp = m_exp * hmask_t_ref[...]                                    # keep own-head rows
    scores = jnp.dot(k_in, m_exp, preferred_element_type=jnp.float32)   # (S, H*S)

    # ---- softmax over keys (sublane axis); lanes stay dense
    s_max = jnp.max(scores, axis=0, keepdims=True)
    p = jnp.exp(scores - s_max)
    inv = pl.reciprocal(jnp.sum(p, axis=0, keepdims=True), approx=True)
    probs = p * inv                                                      # (S, H*S)

    # ---- context (keys contracted); Wv and Wo are folded into w_vo
    ctx = lax.dot_general(probs, v_in, (((0,), (0,)), ((), ())),
                          preferred_element_type=jnp.float32)            # (H*S, E)
    ctx = ctx * hmask_ref[...]
    attn = ctx[0:S, :]
    for h in range(1, n_heads):           # 8-sublane-aligned slices, 7 vadds
        attn = attn + ctx[h * S:(h + 1) * S, :]

    vecs = vecs_ref[...]                  # (6, E)
    bo, g1, be1, g2, be2, bf2 = (vecs[i:i + 1] for i in range(6))

    attn_out = jnp.dot(attn, w_vo, preferred_element_type=jnp.float32) + bo

    # ---- residual + LayerNorm 1 (dropout = identity, eval mode)
    norm1 = _layer_norm(attn_out + v_in, g1, be1)

    # ---- feed forward: Linear(E,4E) -> ReLU -> Linear(4E,E); hidden is lane-dense
    hid = jnp.dot(norm1, w1t_ref[...], preferred_element_type=jnp.float32) + bf1_ref[...]
    hid = jnp.maximum(hid, 0.0)
    ff = jnp.dot(hid, w2t_ref[...], preferred_element_type=jnp.float32) + bf2

    # ---- residual + LayerNorm 2
    out2 = _layer_norm(ff + norm1, g2, be2)                              # (S, E)

    # lane-dense store: pack (S, E) into (S*E/128, 128);
    # slab[r, c*E + e] = out2[c*rows + r, e]; unpacked in the wrapper.
    rows = (S * E) // 128
    groups = 128 // E
    packed = jnp.concatenate(
        [out2[c * rows:(c + 1) * rows, :] for c in range(groups)], axis=1)
    out_ref[0] = packed


def prepack(params, seq):
    """One-time (init-time) weight folding / mask construction."""
    H, d, E = N_HEADS, HEAD_DIM, EMBED_DIM
    f32 = jnp.float32
    eye_h = jnp.eye(H, dtype=f32)

    # fold Wq^T Wk and the 1/sqrt(d) scale into one block-diagonal score matrix,
    # and fold blockdiag(Wv^T) into the output projection.
    a = (params["wq"].T @ params["wk"]) / math.sqrt(d)                  # (d, d)
    a_blk = jnp.kron(eye_h, a)                                          # (E, E)
    w_vo = jnp.kron(eye_h, params["wv"].T) @ params["wo"].T             # (E, E)
    w_ee = jnp.stack([a_blk, w_vo], axis=0)                             # (2, E, E)

    w1t = params["w1"].T                                                # (E, 4E)
    w2t = params["w2"].T                                                # (4E, E)

    vecs = jnp.concatenate([params["bo"], params["g1"], params["be1"],
                            params["g2"], params["be2"], params["bf2"]], axis=0)  # (6, E)
    bf1 = params["bf1"]                                                 # (1, 4E)

    # static masks (no in-kernel iota / divides)
    rep = jnp.tile(jnp.eye(seq, dtype=f32), (1, H))                     # (S, H*S)
    col_head = jnp.arange(H * seq, dtype=jnp.int32) // seq
    row_head = jnp.arange(E, dtype=jnp.int32) // d
    hmask_t = (row_head[:, None] == col_head[None, :]).astype(f32)      # (E, H*S)
    hmask = hmask_t.T                                                   # (H*S, E)

    return dict(w_ee=w_ee, w1t=w1t, w2t=w2t, rep=rep,
                hmask_t=hmask_t, hmask=hmask, vecs=vecs, bf1=bf1)


@jax.jit
def encoder_block(key, query, value, pre):
    B, S, E = key.shape
    assert E == EMBED_DIM and (S * E) % 128 == 0 and 128 % E == 0
    H = N_HEADS
    n_rows = (S * E) // 128
    groups = 128 // E
    f32 = jnp.float32

    def const_spec(shape):
        return pl.BlockSpec(shape, lambda b, _s=shape: (0,) * len(_s))

    token_spec = pl.BlockSpec((1, S, E), lambda b: (b, 0, 0))

    kern = functools.partial(encoder_block_kernel, n_heads=H, seq=S)

    out_slab = pl.pallas_call(
        kern,
        out_shape=jax.ShapeDtypeStruct((B, n_rows, 128), f32),
        grid=(B,),
        in_specs=[token_spec, token_spec, token_spec,
                  const_spec((2, E, E)),
                  const_spec((E, FF_DIM)),
                  const_spec((FF_DIM, E)),
                  const_spec((S, H * S)),
                  const_spec((E, H * S)),
                  const_spec((H * S, E)),
                  const_spec((6, E)),
                  const_spec((1, FF_DIM))],
        out_specs=pl.BlockSpec((1, n_rows, 128), lambda b: (b, 0, 0)),
        compiler_params=pltpu.CompilerParams(
            dimension_semantics=("parallel",),
            vmem_limit_bytes=32 * 1024 * 1024),
    )(key, query, value, pre["w_ee"], pre["w1t"], pre["w2t"],
      pre["rep"], pre["hmask_t"], pre["hmask"], pre["vecs"], pre["bf1"])

    # invert the lane-dense packing: slab[b, r, c*E+e] == out[b, c*n_rows + r, e]
    out = out_slab.reshape(B, n_rows, groups, E).transpose(0, 2, 1, 3).reshape(B, S, E)
    return out


def init_params(rng):
    E, d, F = EMBED_DIM, HEAD_DIM, FF_DIM
    ks = jax.random.split(rng, 9)

    def lin(key, out_f, in_f):
        bound = 1.0 / math.sqrt(in_f)
        return jax.random.uniform(key, (out_f, in_f), jnp.float32, -bound, bound)

    return {
        # attention: shared per-head (d,d) projections (bias=False) + output Linear(E,E)
        "wq": lin(ks[0], d, d),
        "wk": lin(ks[1], d, d),
        "wv": lin(ks[2], d, d),
        "wo": lin(ks[3], E, E),
        "bo": jax.random.uniform(ks[4], (1, E), jnp.float32,
                                 -1.0 / math.sqrt(E), 1.0 / math.sqrt(E)),
        # layer norms
        "g1": jnp.ones((1, E), jnp.float32),
        "be1": jnp.zeros((1, E), jnp.float32),
        "g2": jnp.ones((1, E), jnp.float32),
        "be2": jnp.zeros((1, E), jnp.float32),
        # feed forward
        "w1": lin(ks[5], F, E),
        "bf1": jax.random.uniform(ks[6], (1, F), jnp.float32,
                                  -1.0 / math.sqrt(E), 1.0 / math.sqrt(E)),
        "w2": lin(ks[7], E, F),
        "bf2": jax.random.uniform(ks[8], (1, E), jnp.float32,
                                  -1.0 / math.sqrt(F), 1.0 / math.sqrt(F)),
    }


if __name__ == "__main__":
    B, S = 2, 8
    root = jax.random.PRNGKey(0)
    k_key, k_qry, k_val, k_par = jax.random.split(root, 4)

    key_in = jax.random.normal(k_key, (B, S, EMBED_DIM), jnp.float32)
    query_in = jax.random.normal(k_qry, (B, S, EMBED_DIM), jnp.float32)
    value_in = jax.random.normal(k_val, (B, S, EMBED_DIM), jnp.float32)

    params = init_params(k_par)
    pre = prepack(params, S)          # hoisted one-time packing (not per call)

    out = encoder_block(key_in, query_in, value_in, pre)
    jax.block_until_ready(out)
    assert out.shape == (B, S, EMBED_DIM)
    print("KERNEL_OK")
</pallas_src>

<mosaic_0001>
module attributes {stable_mosaic.version = 11 : i64} {
  func.func @encoder_block_kernel(%arg0: i32, %arg1: memref<1x8x32xf32, #tpu.memory_space<vmem>>, %arg2: memref<1x8x32xf32, #tpu.memory_space<vmem>>, %arg3: memref<1x8x32xf32, #tpu.memory_space<vmem>>, %arg4: memref<2x32x32xf32, #tpu.memory_space<vmem>>, %arg5: memref<32x128xf32, #tpu.memory_space<vmem>>, %arg6: memref<128x32xf32, #tpu.memory_space<vmem>>, %arg7: memref<8x64xf32, #tpu.memory_space<vmem>>, %arg8: memref<32x64xf32, #tpu.memory_space<vmem>>, %arg9: memref<64x32xf32, #tpu.memory_space<vmem>>, %arg10: memref<6x32xf32, #tpu.memory_space<vmem>>, %arg11: memref<1x128xf32, #tpu.memory_space<vmem>>, %arg12: memref<1x2x128xf32, #tpu.memory_space<vmem>>) attributes {dimension_semantics = [#tpu.dimension_semantics<parallel>], iteration_bounds = array<i64: 2>, scalar_prefetch = 0 : i64, scratch_operands = 0 : i64, tpu.core_type = #tpu.core_type<tc>, window_params = [{transform_indices = @transform_0, window_bounds = array<i64: 1, 8, 32>}, {transform_indices = @transform_1, window_bounds = array<i64: 1, 8, 32>}, {transform_indices = @transform_2, window_bounds = array<i64: 1, 8, 32>}, {pipeline_mode = #tpu.pipeline_mode<synchronous>, transform_indices = @transform_3, window_bounds = array<i64: 2, 32, 32>}, {pipeline_mode = #tpu.pipeline_mode<synchronous>, transform_indices = @transform_4, window_bounds = array<i64: 32, 128>}, {pipeline_mode = #tpu.pipeline_mode<synchronous>, transform_indices = @transform_5, window_bounds = array<i64: 128, 32>}, {pipeline_mode = #tpu.pipeline_mode<synchronous>, transform_indices = @transform_6, window_bounds = array<i64: 8, 64>}, {pipeline_mode = #tpu.pipeline_mode<synchronous>, transform_indices = @transform_7, window_bounds = array<i64: 32, 64>}, {pipeline_mode = #tpu.pipeline_mode<synchronous>, transform_indices = @transform_8, window_bounds = array<i64: 64, 32>}, {pipeline_mode = #tpu.pipeline_mode<synchronous>, transform_indices = @transform_9, window_bounds = array<i64: 6, 32>}, {pipeline_mode = #tpu.pipeline_mode<synchronous>, transform_indices = @transform_10, window_bounds = array<i64: 1, 128>}, {transform_indices = @transform_11, window_bounds = array<i64: 1, 2, 128>}]} {
    %c0 = arith.constant 0 : index
    %c0_0 = arith.constant 0 : index
    %c0_1 = arith.constant 0 : index
    %0 = vector.load %arg1[%c0, %c0_0, %c0_1] : memref<1x8x32xf32, #tpu.memory_space<vmem>>, vector<1x8x32xf32>
    %1 = vector.shape_cast %0 : vector<1x8x32xf32> to vector<8x32xf32>
    %c0_2 = arith.constant 0 : index
    %c0_3 = arith.constant 0 : index
    %c0_4 = arith.constant 0 : index
    %2 = vector.load %arg2[%c0_2, %c0_3, %c0_4] : memref<1x8x32xf32, #tpu.memory_space<vmem>>, vector<1x8x32xf32>
    %3 = vector.shape_cast %2 : vector<1x8x32xf32> to vector<8x32xf32>
    %c0_5 = arith.constant 0 : index
    %c0_6 = arith.constant 0 : index
    %c0_7 = arith.constant 0 : index
    %4 = vector.load %arg3[%c0_5, %c0_6, %c0_7] : memref<1x8x32xf32, #tpu.memory_space<vmem>>, vector<1x8x32xf32>
    %5 = vector.shape_cast %4 : vector<1x8x32xf32> to vector<8x32xf32>
    %c0_8 = arith.constant 0 : index
    %c0_9 = arith.constant 0 : index
    %c0_10 = arith.constant 0 : index
    %6 = vector.load %arg4[%c0_8, %c0_9, %c0_10] : memref<2x32x32xf32, #tpu.memory_space<vmem>>, vector<1x32x32xf32>
    %7 = vector.shape_cast %6 : vector<1x32x32xf32> to vector<32x32xf32>
    %c1 = arith.constant 1 : index
    %c0_11 = arith.constant 0 : index
    %c0_12 = arith.constant 0 : index
    %8 = vector.load %arg4[%c1, %c0_11, %c0_12] : memref<2x32x32xf32, #tpu.memory_space<vmem>>, vector<1x32x32xf32>
    %9 = vector.shape_cast %8 : vector<1x32x32xf32> to vector<32x32xf32>
    %cst = arith.constant dense<0.000000e+00> : vector<8x32xf32>
    %10 = tpu.matmul %3, %7, %cst {dimension_numbers = #tpu.dot_dimension_numbers<[1], [0], [0], [1], [0, 0, 1, 1], [], []>} : vector<8x32xf32>, vector<32x32xf32>, vector<8x32xf32> -> vector<8x32xf32>
    %c0_13 = arith.constant 0 : index
    %c0_14 = arith.constant 0 : index
    %11 = vector.load %arg7[%c0_13, %c0_14] : memref<8x64xf32, #tpu.memory_space<vmem>>, vector<8x64xf32>
    %cst_15 = arith.constant dense<0.000000e+00> : vector<32x64xf32>
    %12 = tpu.matmul %10, %11, %cst_15 {dimension_numbers = #tpu.dot_dimension_numbers<[0], [0], [1], [1], [0, 1, 1, 1], [], []>} : vector<8x32xf32>, vector<8x64xf32>, vector<32x64xf32> -> vector<32x64xf32>
    %c0_16 = arith.constant 0 : index
    %c0_17 = arith.constant 0 : index
    %13 = vector.load %arg8[%c0_16, %c0_17] : memref<32x64xf32, #tpu.memory_space<vmem>>, vector<32x64xf32>
    %14 = arith.mulf %12, %13 : vector<32x64xf32>
    %cst_18 = arith.constant dense<0.000000e+00> : vector<8x64xf32>
    %15 = tpu.matmul %1, %14, %cst_18 {dimension_numbers = #tpu.dot_dimension_numbers<[1], [0], [0], [1], [0, 0, 1, 1], [], []>} : vector<8x32xf32>, vector<32x64xf32>, vector<8x64xf32> -> vector<8x64xf32>
    %cst_19 = arith.constant dense<0xFF800000> : vector<64xf32>
    %16 = vector.multi_reduction <maximumf>, %15, %cst_19 [0] : vector<8x64xf32> to vector<64xf32>
    %17 = vector.shape_cast %16 : vector<64xf32> to vector<1x64xf32>
    %18 = vector.broadcast %17 : vector<1x64xf32> to vector<8x64xf32>
    %19 = arith.subf %15, %18 : vector<8x64xf32>
    %20 = math.exp %19 : vector<8x64xf32>
    %cst_20 = arith.constant dense<0.000000e+00> : vector<64xf32>
    %21 = vector.multi_reduction <add>, %20, %cst_20 [0] : vector<8x64xf32> to vector<64xf32>
    %22 = vector.shape_cast %21 : vector<64xf32> to vector<1x64xf32>
    %23 = tpu.reciprocal %22 {approx = true} : vector<1x64xf32> -> vector<1x64xf32>
    %24 = vector.broadcast %23 : vector<1x64xf32> to vector<8x64xf32>
    %25 = arith.mulf %20, %24 : vector<8x64xf32>
    %cst_21 = arith.constant dense<0.000000e+00> : vector<64x32xf32>
    %26 = tpu.matmul %25, %5, %cst_21 {dimension_numbers = #tpu.dot_dimension_numbers<[0], [0], [1], [1], [0, 1, 1, 1], [], []>} : vector<8x64xf32>, vector<8x32xf32>, vector<64x32xf32> -> vector<64x32xf32>
    %c0_22 = arith.constant 0 : index
    %c0_23 = arith.constant 0 : index
    %27 = vector.load %arg9[%c0_22, %c0_23] : memref<64x32xf32, #tpu.memory_space<vmem>>, vector<64x32xf32>
    %28 = arith.mulf %26, %27 : vector<64x32xf32>
    %29 = vector.extract_strided_slice %28 {offsets = [0, 0], sizes = [8, 32], strides = [1, 1]} : vector<64x32xf32> to vector<8x32xf32>
    %30 = vector.extract_strided_slice %28 {offsets = [8, 0], sizes = [8, 32], strides = [1, 1]} : vector<64x32xf32> to vector<8x32xf32>
    %31 = arith.addf %29, %30 : vector<8x32xf32>
    %32 = vector.extract_strided_slice %28 {offsets = [16, 0], sizes = [8, 32], strides = [1, 1]} : vector<64x32xf32> to vector<8x32xf32>
    %33 = arith.addf %31, %32 : vector<8x32xf32>
    %34 = vector.extract_strided_slice %28 {offsets = [24, 0], sizes = [8, 32], strides = [1, 1]} : vector<64x32xf32> to vector<8x32xf32>
    %35 = arith.addf %33, %34 : vector<8x32xf32>
    %36 = vector.extract_strided_slice %28 {offsets = [32, 0], sizes = [8, 32], strides = [1, 1]} : vector<64x32xf32> to vector<8x32xf32>
    %37 = arith.addf %35, %36 : vector<8x32xf32>
    %38 = vector.extract_strided_slice %28 {offsets = [40, 0], sizes = [8, 32], strides = [1, 1]} : vector<64x32xf32> to vector<8x32xf32>
    %39 = arith.addf %37, %38 : vector<8x32xf32>
    %40 = vector.extract_strided_slice %28 {offsets = [48, 0], sizes = [8, 32], strides = [1, 1]} : vector<64x32xf32> to vector<8x32xf32>
    %41 = arith.addf %39, %40 : vector<8x32xf32>
    %42 = vector.extract_strided_slice %28 {offsets = [56, 0], sizes = [8, 32], strides = [1, 1]} : vector<64x32xf32> to vector<8x32xf32>
    %43 = arith.addf %41, %42 : vector<8x32xf32>
    %c0_24 = arith.constant 0 : index
    %c0_25 = arith.constant 0 : index
    %44 = vector.load %arg10[%c0_24, %c0_25] : memref<6x32xf32, #tpu.memory_space<vmem>>, vector<6x32xf32>
    %45 = vector.extract_strided_slice %44 {offsets = [0, 0], sizes = [1, 32], strides = [1, 1]} : vector<6x32xf32> to vector<1x32xf32>
    %46 = vector.extract_strided_slice %44 {offsets = [1, 0], sizes = [1, 32], strides = [1, 1]} : vector<6x32xf32> to vector<1x32xf32>
    %47 = vector.extract_strided_slice %44 {offsets = [2, 0], sizes = [1, 32], strides = [1, 1]} : vector<6x32xf32> to vector<1x32xf32>
    %48 = vector.extract_strided_slice %44 {offsets = [3, 0], sizes = [1, 32], strides = [1, 1]} : vector<6x32xf32> to vector<1x32xf32>
    %49 = vector.extract_strided_slice %44 {offsets = [4, 0], sizes = [1, 32], strides = [1, 1]} : vector<6x32xf32> to vector<1x32xf32>
    %50 = vector.extract_strided_slice %44 {offsets = [5, 0], sizes = [1, 32], strides = [1, 1]} : vector<6x32xf32> to vector<1x32xf32>
    %cst_26 = arith.constant dense<0.000000e+00> : vector<8x32xf32>
    %51 = tpu.matmul %43, %9, %cst_26 {dimension_numbers = #tpu.dot_dimension_numbers<[1], [0], [0], [1], [0, 0, 1, 1], [], []>} : vector<8x32xf32>, vector<32x32xf32>, vector<8x32xf32> -> vector<8x32xf32>
    %52 = vector.broadcast %45 : vector<1x32xf32> to vector<8x32xf32>
    %53 = arith.addf %51, %52 : vector<8x32xf32>
    %54 = arith.addf %53, %5 : vector<8x32xf32>
    %cst_27 = arith.constant dense<0.000000e+00> : vector<8xf32>
    %55 = vector.multi_reduction <add>, %54, %cst_27 [1] : vector<8x32xf32> to vector<8xf32>
    %56 = vector.shape_cast %55 : vector<8xf32> to vector<8x1xf32>
    %cst_28 = arith.constant 3.200000e+01 : f32
    %57 = vector.broadcast %cst_28 : f32 to vector<8x1xf32>
    %58 = arith.divf %56, %57 : vector<8x1xf32>
    %59 = arith.mulf %54, %54 : vector<8x32xf32>
    %cst_29 = arith.constant dense<0.000000e+00> : vector<8xf32>
    %60 = vector.multi_reduction <add>, %59, %cst_29 [1] : vector<8x32xf32> to vector<8xf32>
    %61 = vector.shape_cast %60 : vector<8xf32> to vector<8x1xf32>
    %cst_30 = arith.constant 3.200000e+01 : f32
    %62 = vector.broadcast %cst_30 : f32 to vector<8x1xf32>
    %63 = arith.divf %61, %62 : vector<8x1xf32>
    %64 = arith.mulf %58, %58 : vector<8x1xf32>
    %65 = arith.subf %63, %64 : vector<8x1xf32>
    %66 = vector.broadcast %58 : vector<8x1xf32> to vector<8x32xf32>
    %67 = arith.subf %54, %66 : vector<8x32xf32>
    %cst_31 = arith.constant 9.99999974E-6 : f32
    %68 = vector.broadcast %cst_31 : f32 to vector<8x1xf32>
    %69 = arith.addf %65, %68 : vector<8x1xf32>
    %70 = math.rsqrt %69 : vector<8x1xf32>
    %71 = vector.broadcast %70 : vector<8x1xf32> to vector<8x32xf32>
    %72 = arith.mulf %67, %71 : vector<8x32xf32>
    %73 = vector.broadcast %46 : vector<1x32xf32> to vector<8x32xf32>
    %74 = arith.mulf %72, %73 : vector<8x32xf32>
    %75 = vector.broadcast %47 : vector<1x32xf32> to vector<8x32xf32>
    %76 = arith.addf %74, %75 : vector<8x32xf32>
    %c0_32 = arith.constant 0 : index
    %c0_33 = arith.constant 0 : index
    %77 = vector.load %arg5[%c0_32, %c0_33] : memref<32x128xf32, #tpu.memory_space<vmem>>, vector<32x128xf32>
    %cst_34 = arith.constant dense<0.000000e+00> : vector<8x128xf32>
    %78 = tpu.matmul %76, %77, %cst_34 {dimension_numbers = #tpu.dot_dimension_numbers<[1], [0], [0], [1], [0, 0, 1, 1], [], []>} : vector<8x32xf32>, vector<32x128xf32>, vector<8x128xf32> -> vector<8x128xf32>
    %c0_35 = arith.constant 0 : index
    %c0_36 = arith.constant 0 : index
    %79 = vector.load %arg11[%c0_35, %c0_36] : memref<1x128xf32, #tpu.memory_space<vmem>>, vector<1x128xf32>
    %80 = vector.broadcast %79 : vector<1x128xf32> to vector<8x128xf32>
    %81 = arith.addf %78, %80 : vector<8x128xf32>
    %cst_37 = arith.constant 0.000000e+00 : f32
    %82 = vector.broadcast %cst_37 : f32 to vector<8x128xf32>
    %83 = arith.maximumf %81, %82 : vector<8x128xf32>
    %c0_38 = arith.constant 0 : index
    %c0_39 = arith.constant 0 : index
    %84 = vector.load %arg6[%c0_38, %c0_39] : memref<128x32xf32, #tpu.memory_space<vmem>>, vector<128x32xf32>
    %cst_40 = arith.constant dense<0.000000e+00> : vector<8x32xf32>
    %85 = tpu.matmul %83, %84, %cst_40 {dimension_numbers = #tpu.dot_dimension_numbers<[1], [0], [0], [1], [0, 0, 1, 1], [], []>} : vector<8x128xf32>, vector<128x32xf32>, vector<8x32xf32> -> vector<8x32xf32>
    %86 = vector.broadcast %50 : vector<1x32xf32> to vector<8x32xf32>
    %87 = arith.addf %85, %86 : vector<8x32xf32>
    %88 = arith.addf %87, %76 : vector<8x32xf32>
    %cst_41 = arith.constant dense<0.000000e+00> : vector<8xf32>
    %89 = vector.multi_reduction <add>, %88, %cst_41 [1] : vector<8x32xf32> to vector<8xf32>
    %90 = vector.shape_cast %89 : vector<8xf32> to vector<8x1xf32>
    %cst_42 = arith.constant 3.200000e+01 : f32
    %91 = vector.broadcast %cst_42 : f32 to vector<8x1xf32>
    %92 = arith.divf %90, %91 : vector<8x1xf32>
    %93 = arith.mulf %88, %88 : vector<8x32xf32>
    %cst_43 = arith.constant dense<0.000000e+00> : vector<8xf32>
    %94 = vector.multi_reduction <add>, %93, %cst_43 [1] : vector<8x32xf32> to vector<8xf32>
    %95 = vector.shape_cast %94 : vector<8xf32> to vector<8x1xf32>
    %cst_44 = arith.constant 3.200000e+01 : f32
    %96 = vector.broadcast %cst_44 : f32 to vector<8x1xf32>
    %97 = arith.divf %95, %96 : vector<8x1xf32>
    %98 = arith.mulf %92, %92 : vector<8x1xf32>
    %99 = arith.subf %97, %98 : vector<8x1xf32>
    %100 = vector.broadcast %92 : vector<8x1xf32> to vector<8x32xf32>
    %101 = arith.subf %88, %100 : vector<8x32xf32>
    %cst_45 = arith.constant 9.99999974E-6 : f32
    %102 = vector.broadcast %cst_45 : f32 to vector<8x1xf32>
    %103 = arith.addf %99, %102 : vector<8x1xf32>
    %104 = math.rsqrt %103 : vector<8x1xf32>
    %105 = vector.broadcast %104 : vector<8x1xf32> to vector<8x32xf32>
    %106 = arith.mulf %101, %105 : vector<8x32xf32>
    %107 = vector.broadcast %48 : vector<1x32xf32> to vector<8x32xf32>
    %108 = arith.mulf %106, %107 : vector<8x32xf32>
    %109 = vector.broadcast %49 : vector<1x32xf32> to vector<8x32xf32>
    %110 = arith.addf %108, %109 : vector<8x32xf32>
    %111 = vector.extract_strided_slice %110 {offsets = [0, 0], sizes = [2, 32], strides = [1, 1]} : vector<8x32xf32> to vector<2x32xf32>
    %112 = vector.extract_strided_slice %110 {offsets = [2, 0], sizes = [2, 32], strides = [1, 1]} : vector<8x32xf32> to vector<2x32xf32>
    %113 = vector.extract_strided_slice %110 {offsets = [4, 0], sizes = [2, 32], strides = [1, 1]} : vector<8x32xf32> to vector<2x32xf32>
    %114 = vector.extract_strided_slice %110 {offsets = [6, 0], sizes = [2, 32], strides = [1, 1]} : vector<8x32xf32> to vector<2x32xf32>
    %115 = tpu.concatenate %111, %112, %113, %114 in 1 : vector<2x32xf32>, vector<2x32xf32>, vector<2x32xf32>, vector<2x32xf32> -> vector<2x128xf32>
    %c0_46 = arith.constant 0 : index
    %c0_47 = arith.constant 0 : index
    %c0_48 = arith.constant 0 : index
    %116 = vector.load %arg12[%c0_46, %c0_47, %c0_48] : memref<1x2x128xf32, #tpu.memory_space<vmem>>, vector<1x2x128xf32>
    %117 = vector.shape_cast %116 : vector<1x2x128xf32> to vector<2x128xf32>
    %118 = vector.shape_cast %115 : vector<2x128xf32> to vector<1x2x128xf32>
    tpu.vector_store %arg12[%c0_46, %c0_47, %c0_48], %118 {strides = array<i32>} : memref<1x2x128xf32, #tpu.memory_space<vmem>>, vector<1x2x128xf32>,
    return
  }
  func.func @transform_0(%arg0: i32) -> (i32, i32, i32) {
    %c0_i32 = arith.constant 0 : i32
    %c0_i32_0 = arith.constant 0 : i32
    %c0_i32_1 = arith.constant 0 : i32
    return %arg0, %c0_i32, %c0_i32_0 : i32, i32, i32
  }
  func.func @transform_1(%arg0: i32) -> (i32, i32, i32) {
    %c0_i32 = arith.constant 0 : i32
    %c0_i32_0 = arith.constant 0 : i32
    %c0_i32_1 = arith.constant 0 : i32
    return %arg0, %c0_i32, %c0_i32_0 : i32, i32, i32
  }
  func.func @transform_2(%arg0: i32) -> (i32, i32, i32) {
    %c0_i32 = arith.constant 0 : i32
    %c0_i32_0 = arith.constant 0 : i32
    %c0_i32_1 = arith.constant 0 : i32
    return %arg0, %c0_i32, %c0_i32_0 : i32, i32, i32
  }
  func.func @transform_3(%arg0: i32) -> (i32, i32, i32) {
    %c0_i32 = arith.constant 0 : i32
    %c0_i32_0 = arith.constant 0 : i32
    %c0_i32_1 = arith.constant 0 : i32
    %c0_i32_2 = arith.constant 0 : i32
    return %c0_i32, %c0_i32_0, %c0_i32_1 : i32, i32, i32
  }
  func.func @transform_4(%arg0: i32) -> (i32, i32) {
    %c0_i32 = arith.constant 0 : i32
    %c0_i32_0 = arith.constant 0 : i32
    %c0_i32_1 = arith.constant 0 : i32
    return %c0_i32, %c0_i32_0 : i32, i32
  }
  func.func @transform_5(%arg0: i32) -> (i32, i32) {
    %c0_i32 = arith.constant 0 : i32
    %c0_i32_0 = arith.constant 0 : i32
    %c0_i32_1 = arith.constant 0 : i32
    return %c0_i32, %c0_i32_0 : i32, i32
  }
  func.func @transform_6(%arg0: i32) -> (i32, i32) {
    %c0_i32 = arith.constant 0 : i32
    %c0_i32_0 = arith.constant 0 : i32
    %c0_i32_1 = arith.constant 0 : i32
    return %c0_i32, %c0_i32_0 : i32, i32
  }
  func.func @transform_7(%arg0: i32) -> (i32, i32) {
    %c0_i32 = arith.constant 0 : i32
    %c0_i32_0 = arith.constant 0 : i32
    %c0_i32_1 = arith.constant 0 : i32
    return %c0_i32, %c0_i32_0 : i32, i32
  }
  func.func @transform_8(%arg0: i32) -> (i32, i32) {
    %c0_i32 = arith.constant 0 : i32
    %c0_i32_0 = arith.constant 0 : i32
    %c0_i32_1 = arith.constant 0 : i32
    return %c0_i32, %c0_i32_0 : i32, i32
  }
  func.func @transform_9(%arg0: i32) -> (i32, i32) {
    %c0_i32 = arith.constant 0 : i32
    %c0_i32_0 = arith.constant 0 : i32
    %c0_i32_1 = arith.constant 0 : i32
    return %c0_i32, %c0_i32_0 : i32, i32
  }
  func.func @transform_10(%arg0: i32) -> (i32, i32) {
    %c0_i32 = arith.constant 0 : i32
    %c0_i32_0 = arith.constant 0 : i32
    %c0_i32_1 = arith.constant 0 : i32
    return %c0_i32, %c0_i32_0 : i32, i32
  }
  func.func @transform_11(%arg0: i32) -> (i32, i32, i32) {
    %c0_i32 = arith.constant 0 : i32
    %c0_i32_0 = arith.constant 0 : i32
    %c0_i32_1 = arith.constant 0 : i32
    return %arg0, %c0_i32, %c0_i32_0 : i32, i32, i32
  }
}

</mosaic_0001>

<bundles_post_ra>
// kernel: encoder_block.1
= control target key start
LH: loop header
LB: loop body
LE: loop exit
PB: predicated region body
PF: predicated region fallthrough
CT: control target
= control target key end

     0   :  { %s1080_s17 = smov 0   ;;  %s1290_s0 = inlined_call_operand.vmem [shape: f32[2,8,32], index: 0, kind: input, shape index: {}]   ;;  %s1291_s1 = inlined_call_operand.vmem [shape: f32[2,8,32], index: 1, kind: input, shape index: {}]   ;;  %s1292_s2 = inlined_call_operand.vmem [shape: f32[2,8,32], index: 2, kind: input, shape index: {}]   ;;  %s1293_s3 = inlined_call_operand.vmem [shape: f32[2,32,32], index: 3, kind: input, shape index: {}]   ;;  %s1294_s4 = inlined_call_operand.vmem [shape: f32[32,128], index: 4, kind: input, shape index: {}]   ;;  %s1295_s5 = inlined_call_operand.vmem [shape: f32[128,32], index: 5, kind: input, shape index: {}]   ;;  %s1296_s6 = inlined_call_operand.vmem [shape: f32[8,64], index: 6, kind: input, shape index: {}]   ;;  %s1297_s7 = inlined_call_operand.vmem [shape: f32[32,64], index: 7, kind: input, shape index: {}]   ;;  %s1298_s8 = inlined_call_operand.vmem [shape: f32[64,32], index: 8, kind: input, shape index: {}]   ;;  %s1299_s9 = inlined_call_operand.vmem [shape: f32[6,32], index: 9, kind: input, shape index: {}]   ;;  %s1300_s10 = inlined_call_operand.vmem [shape: f32[1,128], index: 10, kind: input, shape index: {}]   ;;  %s1301_s11 = inlined_call_operand.vmem [shape: f32[2,2,128], index: 11, kind: output, shape index: {}]  }
   0x1 LB: > { %s952_s18 = sadd.s32 4294967295, %s1014_s17   ;;  %p956_p0 = scmp.ge.s32.totalorder %s1014_s17, 1  ;;  %s1014_s17 = sphi %s1080_s17, %s21_s17  }
   0x2   : > { %p354_p1 = scmp.lt.s32.totalorder %s1014_s17, 3 }
   0x4   : > { %p355_p2 = pnand %p956_p0, %p354_p1 }
   0x5   : > { %p400_p3 = scmp.lt.s32.totalorder (!%p355_p2), %s952_s18, 1  ;;  %s1018_s12 = smov (!%p355_p2), 64  }
   0x6   : > { %358 = sbr.rel (%p355_p2) target bundleno = 1838 (0x72e), region = 64  ;;  %s1019_s13 = smov (!%p355_p2), 32  }
   0xb   : > { %v422_v0 = vld [vmem:[%s1293_s3 + $0x18] sm:$0xff]  ;;  %v421_v1 = vld [vmem:[%s1293_s3 + $0x10] sm:$0xff]  ;;  %v420_v2 = vld [vmem:[%s1293_s3 + $0x8] sm:$0xff]  ;;  %s1303_s18 = smov (!%p400_p3, %s952_s18), 1  ;;  %vm428_vm0 = vcmask 261120   ;;  %vm485_vm1 = vcmask 64512  }
   0xc   : > { %444 = vmatpush.msra.mxu2 %v422_v0  ;;  %v419_v3 = vld [vmem:[%s1293_s3] sm:$0xff]  ;;  %s1103_s27 = sshll.u32 %s1303_s18, 3  ;;  %v530_v14 = vld [vmem:[%s1297_s7 + $0x18] sm:$0xff]  ;;  %v529_v15 = vld [vmem:[%s1297_s7 + $0x10] sm:$0xff]  ;;  %vm558_vm2 = vcmask 523264   ;;  %s960_s14 = sshll.u32 %s1303_s18, 1 }
   0xd   : > { %s407_s30 = scalar_lea.vmem %s1291_s1, %s1103_s27  ;;  %v452_v5 = vld [vmem:[%s1296_s6] sm:$0xff]  ;;  %v528_v18 = vld [vmem:[%s1297_s7 + $0x8] sm:$0xff]  ;;  %s403_s26 = scalar_lea.vmem %s1290_s0, %s1103_s27  ;;  %v964_v53 = vld [vmem:[%s1293_s3 + $0x38] sm:$0xff]  ;;  %vm872_vm10 = vcmask 785408  }
   0xe   : > { %445 = vmatpush.msra.mxu2 %v421_v1  ;;  %v417_v4 = vld [vmem:[%s407_s30] sm:$0xff]  ;;  %513 = vmatpush.msra.mxu1 %v452_v5  ;;  %s411_s30 = scalar_lea.vmem %s1292_s2, %s1103_s27  ;;  %v963_v54 = vld [vmem:[%s1293_s3 + $0x30] sm:$0xff]  ;;  %v962_v55 = vld [vmem:[%s1293_s3 + $0x28] sm:$0xff]  ;;  %s1017_s27 = smov 96  }
   0xf   : > { %v527_v20 = vld [vmem:[%s1297_s7] sm:$0xff]  ;;  %v676_v61 = vld [vmem:[%s1298_s8 + $0x8] sm:$0xff]  ;;  %v677_v1 = vld [vmem:[%s1298_s8 + $0x10] sm:$0xff]  ;;  %s415_s19 = scalar_lea.vmem %s1301_s11, %s960_s14 }
  0x10   : > { %446 = vmatpush.msra.mxu2 %v420_v2  ;;  %v416_v23 = vld [vmem:[%s403_s26] sm:$0xff] }
  0x11   : > { %v1139_v33 = vld [vmem:[%s411_s30] sm:$0xff] }
  0x12   : > { %447 = vmatpush.msra.mxu2 %v419_v3  ;;  %649 = vmatpush.msra.mxu0 %v1139_v33  ;;  %v961_v58 = vld [vmem:[%s1293_s3 + $0x20] sm:$0xff]  ;;  %v678_v3 = vld [vmem:[%s1298_s8 + $0x18] sm:$0xff] }
  0x13   : > { %965 = vmatmul.msk.f32.vlgmr.msra.gmra.mxu2 %vm428_vm0, %v417_v4  ;;  %983 = vmatpush.msra.mxu3 %v1139_v33  ;;  %v675_v63 = vld [vmem:[%s1298_s8] sm:$0xff] }
  0x14   : > { %715 = vmatpush.msrb.mxu0 %v964_v53 }
  0x16   : > { %716 = vmatpush.msrb.mxu0 %v963_v54  ;;  %v802_v54 = vld [vmem:[%s1295_s5 + $0x58] sm:$0xff] }
  0x18   : > { %717 = vmatpush.msrb.mxu0 %v962_v55  ;;  %v801_v55 = vld [vmem:[%s1295_s5 + $0x50] sm:$0xff] }
  0x1a   : > { %718 = vmatpush.msrb.mxu0 %v961_v58 }
  0x96   : > { %v449_v6 = vpop.f32.mrf.mxu2 }
  0x97   : > { %453 = vxpose.xlu0.b32.start.end [1/1] (short) (narrow) %v449_v6, 32  ;;  %v679_v6 = vld [vmem:[%s1298_s8 + $0x20] sm:$0xff] }
 0x13b   : > { %v469_v7 = vpop.trf.xlu0 }
 0x13c   : > { %966 = vmatmul.msk.f32.vlgmr.msra.gmra.mxu1 %vm485_vm1, %v469_v7 }
 0x143   : > { %v470_v8 = vpop.trf.xlu0 }
 0x144   : > { %967 = vmatmul.msk.f32.gmra.mxu1 %vm485_vm1, %v470_v8 }
 0x14b   : > { %v471_v9 = vpop.trf.xlu0 }
 0x14c   : > { %968 = vmatmul.msk.f32.gmra.mxu1 %vm485_vm1, %v471_v9  ;;  %v680_v9 = vld [vmem:[%s1298_s8 + $0x28] sm:$0xff] }
 0x153   : > { %v472_v10 = vpop.trf.xlu0 }
 0x154   : > { %969 = vmatmul.msk.f32.gmra.mxu1 %vm485_vm1, %v472_v10 }
 0x1b9   : > { %v515_v11 = vpop.f32.mrf.mxu1 }
 0x1ba   : > { %v531_v22 = vmul.f32 %v527_v20, %v515_v11 }
 0x1c1   : > { %v518_v12 = vpop.f32.mrf.mxu1 }
 0x1c2   : > { %v532_v21 = vmul.f32 %v528_v18, %v518_v12  ;;  %v682_v18 = vld [vmem:[%s1298_s8 + $0x38] sm:$0xff] }
 0x1c9   : > { %v521_v13 = vpop.f32.mrf.mxu1 }
 0x1ca   : > { %v533_v19 = vmul.f32 %v529_v15, %v521_v13  ;;  %v681_v13 = vld [vmem:[%s1298_s8 + $0x30] sm:$0xff] }
 0x1d1   : > { %v524_v16 = vpop.f32.mrf.mxu1 }
 0x1d2   : > { %v534_v17 = vmul.f32 %v530_v14, %v524_v16 }
 0x1d4   : > { %550 = vmatpush.msrb.mxu2 %v534_v17 }
 0x1d6   : > { %551 = vmatpush.msrb.mxu2 %v533_v19 }
 0x1d8   : > { %552 = vmatpush.msrb.mxu2 %v532_v21 }
 0x1da   : > { %553 = vmatpush.msrb.mxu2 %v531_v22 }
 0x1db   : > { %970 = vmatmul.msk.f32.vlgmr.msrb.gmra.mxu2 %vm428_vm0, %v416_v23 }
 0x25e   : > { %v555_v24 = vpop.f32.mrf.mxu2 }
 0x25f   : > { %v559_v25 = vsel %vm558_vm2, %v555_v24, -inf }
 0x260   : > { %v560_v26 = vrot.slane %v559_v25, 4 }
 0x262   : > { %v561_v27 = vmax.f32 %v559_v25, %v560_v26 }
 0x264   : > { %v562_v28 = vrot.slane %v561_v27, 2 }
 0x266   : > { %v563_v29 = vmax.f32 %v561_v27, %v562_v28 }
 0x268   : > { %v564_v30 = vrot.slane %v563_v29, 1 }
 0x26a   : > { %v565_v31 = vmax.f32 %v563_v29, %v564_v30 }
 0x26c   : > { %v566_v32 = vsub.f32 %v555_v24, %v565_v31  ;;  %v1192_v24 = vld [vmem:[%s1299_s9] sm:$0x3f] }
 0x26d   : > { %v699_v25 = vperm.slane %v1192_v24, 0 }
 0x26e   : > { %v567_v34 = vmul.f32 1.442695, %v566_v32  ;;  %v1016_v32 = vmov 32.0  }
 0x270   : > { %998 = vpow2.f32 %v567_v34 }
 0x276   : > { %v999_v35 = vpop.eup %998 }
 0x277   : > { %v569_v36 = vsel %vm558_vm2, %v999_v35, 0.0 }
 0x278   : > { %v570_v37 = vrot.slane %v569_v36, 4 }
 0x27a   : > { %v571_v38 = vadd.f32 %v570_v37, %v569_v36 }
 0x27c   : > { %v572_v39 = vrot.slane %v571_v38, 2 }
 0x27e   : > { %v573_v40 = vadd.f32 %v572_v39, %v571_v38 }
 0x280   : > { %v574_v41 = vrot.slane %v573_v40, 1 }
 0x282   : > { %v575_v42 = vadd.f32 %v574_v41, %v573_v40  ;;  %v761_v40 = vld [vmem:[%s1294_s4 + $0x10] sm:$0xff] }
 0x284   : > { %1000 = vrcp.f32 %v575_v42  ;;  %v760_v42 = vld [vmem:[%s1294_s4 + $0x8] sm:$0xff] }
 0x285   : > { %1002 = vrcp.f32 %v1016_v32 }
 0x28a   : > { %v1001_v43 = vpop.eup %1000 }
 0x28b   : > { %v577_v44 = vmul.f32 %v1001_v43, %v999_v35  ;;  %v1003_v34 = vpop.eup %1002  ;;  %v759_v43 = vld [vmem:[%s1294_s4] sm:$0xff] }
 0x28c   : > { %v728_v35 = vmul.f32 32.0, %v1003_v34  ;;  %vm732_vm3 = vweird.f32 %v1003_v34 }
 0x28d   : > { %578 = vxpose.xlu0.b32.start.end [1/1] (short) (narrow) %v577_v44, 64 }
 0x28e   : > { %v729_v36 = vsub.f32 1.0, %v728_v35 }
 0x290   : > { %v730_v37 = vmul.f32 %v1003_v34, %v729_v36 }
 0x292   : > { %v731_v38 = vadd.f32 %v1003_v34, %v730_v37 }
 0x294   : > { %v1209_v41 = vsel %vm732_vm3, %v1003_v34, %v731_v38 }
 0x331   : > { %v594_v45 = vpop.trf.xlu0 }
 0x332   : > { %971 = vmatmul.msk.f32.vlgmr.msra.gmra.mxu0 %vm485_vm1, %v594_v45  ;;  %v806_v45 = vld [vmem:[%s1295_s5 + $0x78] sm:$0xff] }
 0x333   : > { %808 = vmatpush.msrb.mxu1 %v806_v45 }
 0x339   : > { %v595_v46 = vpop.trf.xlu0 }
 0x33a   : > { %972 = vmatmul.msk.f32.gmra.mxu0 %vm485_vm1, %v595_v46  ;;  %v805_v46 = vld [vmem:[%s1295_s5 + $0x70] sm:$0xff] }
 0x33b   : > { %809 = vmatpush.msrb.mxu1 %v805_v46 }
 0x341   : > { %v596_v47 = vpop.trf.xlu0 }
 0x342   : > { %973 = vmatmul.msk.f32.gmra.mxu0 %vm485_vm1, %v596_v47 }
 0x349   : > { %v597_v48 = vpop.trf.xlu0 }
 0x34a   : > { %974 = vmatmul.msk.f32.vlgmr.msra.gmra.mxu3 %vm485_vm1, %v597_v48 }
 0x351   : > { %v598_v49 = vpop.trf.xlu0 }
 0x352   : > { %975 = vmatmul.msk.f32.gmra.mxu3 %vm485_vm1, %v598_v49 }
 0x359   : > { %v599_v50 = vpop.trf.xlu0 }
 0x35a   : > { %976 = vmatmul.msk.f32.gmra.mxu3 %vm485_vm1, %v599_v50  ;;  %v804_v50 = vld [vmem:[%s1295_s5 + $0x68] sm:$0xff] }
 0x35b   : > { %810 = vmatpush.msrb.mxu1 %v804_v50 }
 0x361   : > { %v600_v51 = vpop.trf.xlu0 }
 0x362   : > { %977 = vmatmul.msk.f32.gmra.mxu3 %vm485_vm1, %v600_v51 }
 0x369   : > { %v601_v52 = vpop.trf.xlu0 }
 0x36a   : > { %978 = vmatmul.msk.f32.gmra.mxu3 %vm485_vm1, %v601_v52  ;;  %v803_v52 = vld [vmem:[%s1295_s5 + $0x60] sm:$0xff] }
 0x36b   : > { %811 = vmatpush.msrb.mxu1 %v803_v52 }
 0x36d   : > { %812 = vmatpush.msrb.mxu1 %v802_v54 }
 0x36f   : > { %813 = vmatpush.msrb.mxu1 %v801_v55 }
 0x3af   : > { %v651_v56 = vpop.f32.mrf.mxu0 }
 0x3b0   : > { %v683_v4 = vmul.f32 %v675_v63, %v651_v56  ;;  %v800_v56 = vld [vmem:[%s1295_s5 + $0x48] sm:$0xff] }
 0x3b1   : > { %814 = vmatpush.msrb.mxu1 %v800_v56  ;;  %v796_v63 = vld [vmem:[%s1295_s5 + $0x28] sm:$0xff] }
 0x3b7   : > { %v654_v59 = vpop.f32.mrf.mxu0 }
 0x3b8   : > { %v684_v2 = vmul.f32 %v676_v61, %v654_v59  ;;  %v798_v59 = vld [vmem:[%s1295_s5 + $0x38] sm:$0xff]  ;;  %v797_v61 = vld [vmem:[%s1295_s5 + $0x30] sm:$0xff] }
 0x3ba   : > { %v691_v7 = vadd.f32 %v684_v2, %v683_v4 }
 0x3bf   : > { %v657_v0 = vpop.f32.mrf.mxu0 }
 0x3c0   : > { %v685_v5 = vmul.f32 %v677_v1, %v657_v0  ;;  %v795_v1 = vld [vmem:[%s1295_s5 + $0x20] sm:$0xff] }
 0x3c2   : > { %v692_v11 = vadd.f32 %v691_v7, %v685_v5 }
 0x3cd   : > { %v660_v57 = vpop.f32.mrf.mxu3 }
 0x3ce   : > { %v686_v8 = vmul.f32 %v678_v3, %v660_v57  ;;  %v799_v57 = vld [vmem:[%s1295_s5 + $0x40] sm:$0xff]  ;;  %v794_v3 = vld [vmem:[%s1295_s5 + $0x18] sm:$0xff] }
 0x3cf   : > { %815 = vmatpush.msrb.mxu1 %v799_v57 }
 0x3d0   : > { %v693_v14 = vadd.f32 %v692_v11, %v686_v8 }
 0x3d1   : > { %816 = vmatpush.msrb.mxu1 %v798_v59 }
 0x3d3   : > { %817 = vmatpush.msrb.mxu1 %v797_v61 }
 0x3d5   : > { %v663_v60 = vpop.f32.mrf.mxu3  ;;  %818 = vmatpush.msrb.mxu1 %v796_v63 }
 0x3d6   : > { %v687_v12 = vmul.f32 %v679_v6, %v663_v60  ;;  %v755_v6 = vperm.slane %v1192_v24, 1 }
 0x3d7   : > { %819 = vmatpush.msrb.mxu1 %v795_v1 }
 0x3d8   : > { %v694_v16 = vadd.f32 %v693_v14, %v687_v12  ;;  %v793_v12 = vld [vmem:[%s1295_s5 + $0x10] sm:$0xff]  ;;  %v791_v14 = vld [vmem:[%s1295_s5] sm:$0xff] }
 0x3d9   : > { %820 = vmatpush.msrb.mxu1 %v794_v3 }
 0x3db   : > { %821 = vmatpush.msrb.mxu1 %v793_v12 }
 0x3dd   : > { %v666_v62 = vpop.f32.mrf.mxu3 }
 0x3de   : > { %v688_v15 = vmul.f32 %v680_v9, %v666_v62  ;;  %v757_v9 = vperm.slane %v1192_v24, 2 }
 0x3e0   : > { %v695_v19 = vadd.f32 %v694_v16, %v688_v15  ;;  %v997_v15 = vld [vmem:[%s1300_s10] ss:$0 sm:$0xff] }
 0x3e5   : > { %v669_v10 = vpop.f32.mrf.mxu3 }
 0x3e6   : > { %v689_v17 = vmul.f32 %v681_v13, %v669_v10  ;;  %v792_v13 = vld [vmem:[%s1295_s5 + $0x8] sm:$0xff] }
 0x3e7   : > { %822 = vmatpush.msrb.mxu1 %v792_v13 }
 0x3e8   : > { %v696_v21 = vadd.f32 %v695_v19, %v689_v17  ;;  %v807_v19 = vperm.slane %v1192_v24, 5 }
 0x3e9   : > { %823 = vmatpush.msrb.mxu1 %v791_v14 }
 0x3ed   : > { %v672_v20 = vpop.f32.mrf.mxu3 }
 0x3ee   : > { %v690_v22 = vmul.f32 %v682_v18, %v672_v20 }
 0x3f0   : > { %v697_v23 = vadd.f32 %v696_v21, %v690_v22 }
 0x3f2   : > { %979 = vmatmul.msk.f32.vlgmr.msrb.gmra.mxu0 %vm428_vm0, %v697_v23 }
 0x46f   : > { %v720_v26 = vpop.f32.mrf.mxu0 }
 0x470   : > { %v721_v27 = vadd.f32 %v720_v26, %v699_v25 }
 0x472   : > { %v1196_v28 = vadd.f32 %v721_v27, %v1139_v33  ;;  %v762_v33 = vld [vmem:[%s1294_s4 + $0x18] sm:$0xff] }
 0x473   : > { %782 = vmatpush.msra.mxu2 %v762_v33 }
 0x474   : > { %v724_v29 = vsel %vm428_vm0, %v1196_v28, 0.0  ;;  %v735_v30 = vmul.f32 %v1196_v28, %v1196_v28 }
 0x475   : > { %725 = vadd.xlane.f32.xlu1 %v724_v29  ;;  %783 = vmatpush.msra.mxu2 %v761_v40 }
 0x476   : > { %v736_v31 = vsel %vm428_vm0, %v735_v30, 0.0 }
 0x477   : > { %784 = vmatpush.msra.mxu2 %v760_v42  ;;  %v853_v42 = vperm.slane %v1192_v24, 3 }
 0x479   : > { %785 = vmatpush.msra.mxu2 %v759_v43 }
 0x47d   : > { %737 = vadd.xlane.f32.xlu1 %v736_v31 }
 0x4e8   : > { %v726_v39 = vpop.xlane.xlu1 %725 }
 0x4e9   : > { %v734_v44 = vmul.f32 %v1209_v41, %v726_v39 }
 0x4eb   : > { %v740_v48 = vmul.f32 %v734_v44, %v734_v44  ;;  %v742_v5 = vsub.f32 %v1196_v28, %v734_v44 }
 0x4f0   : > { %v738_v47 = vpop.xlane.xlu1 %737 }
 0x4f1   : > { %v739_v49 = vmul.f32 %v738_v47, %v1209_v41 }
 0x4f3   : > { %v741_v51 = vsub.f32 %v739_v49, %v740_v48 }
 0x4f5   : > { %v743_v53 = vadd.f32 1e-05, %v741_v51 }
 0x4f7   : > { %1004 = vrsqrt.f32 %v743_v53  ;;  %vm750_vm5 = vweird.f32 %v743_v53 }
 0x4fd   : > { %v1005_v58 = vpop.eup %1004 }
 0x4fe   : > { %v745_v60 = vmul.f32 %v1005_v58, %v743_v53  ;;  %vm751_vm4 = vweird.f32 %v1005_v58 }
 0x4ff   : > { %vm752_vm6 = vmor %vm750_vm5, %vm751_vm4 }
 0x500   : > { %v746_v62 = vmul.f32 %v1005_v58, %v745_v60 }
 0x502   : > { %v747_v0 = vmul.f32 0.5, %v746_v62 }
 0x504   : > { %v748_v2 = vsub.f32 1.5, %v747_v0 }
 0x506   : > { %v749_v4 = vmul.f32 %v1005_v58, %v748_v2 }
 0x508   : > { %v753_v7 = vsel %vm752_vm6, %v1005_v58, %v749_v4 }
 0x509   : > { %v754_v8 = vmul.f32 %v753_v7, %v742_v5 }
 0x50b   : > { %v756_v10 = vmul.f32 %v755_v6, %v754_v8 }
 0x50d   : > { %v758_v11 = vadd.f32 %v757_v9, %v756_v10 }
 0x50f   : > { %980 = vmatmul.msk.f32.vlgmr.msra.gmra.mxu2 %vm428_vm0, %v758_v11 }
 0x592   : > { %v787_v16 = vpop.f32.mrf.mxu2 }
 0x593   : > { %v788_v17 = vadd.f32 %v997_v15, %v787_v16 }
 0x595   : > { %v790_v18 = vmax.f32 %v788_v17, 0.0 }
 0x597   : > { %824 = vmatmul.f32.vlgmr.msrb.gmra.mxu1 %v790_v18 }
 0x614   : > { %v825_v20 = vpop.f32.mrf.mxu1 }
 0x615   : > { %v826_v21 = vadd.f32 %v825_v20, %v807_v19 }
 0x617   : > { %v828_v22 = vadd.f32 %v826_v21, %v758_v11 }
 0x619   : > { %v829_v23 = vsel %vm428_vm0, %v828_v22, 0.0  ;;  %v833_v25 = vmul.f32 %v828_v22, %v828_v22 }
 0x61a   : > { %830 = vadd.xlane.f32.xlu2 %v829_v23 }
 0x61b   : > { %v834_v26 = vsel %vm428_vm0, %v833_v25, 0.0 }
 0x622   : > { %835 = vadd.xlane.f32.xlu2 %v834_v26 }
 0x68d   : > { %v831_v27 = vpop.xlane.xlu2 %830 }
 0x68e   : > { %v832_v28 = vmul.f32 %v831_v27, %v1209_v41 }
 0x690   : > { %v838_v30 = vmul.f32 %v832_v28, %v832_v28  ;;  %v840_v40 = vsub.f32 %v828_v22, %v832_v28 }
 0x695   : > { %v836_v29 = vpop.xlane.xlu2 %835 }
 0x696   : > { %v837_v31 = vmul.f32 %v836_v29, %v1209_v41  ;;  %v855_v41 = vperm.slane %v1192_v24, 4 }
 0x698   : > { %v839_v32 = vsub.f32 %v837_v31, %v838_v30 }
 0x69a   : > { %v841_v34 = vadd.f32 1e-05, %v839_v32 }
 0x69c   : > { %1006 = vrsqrt.f32 %v841_v34  ;;  %vm848_vm8 = vweird.f32 %v841_v34 }
 0x6a2   : > { %v1007_v35 = vpop.eup %1006 }
 0x6a3   : > { %v843_v36 = vmul.f32 %v1007_v35, %v841_v34  ;;  %vm849_vm7 = vweird.f32 %v1007_v35 }
 0x6a4   : > { %vm850_vm9 = vmor %vm848_vm8, %vm849_vm7 }
 0x6a5   : > { %v844_v37 = vmul.f32 %v1007_v35, %v843_v36 }
 0x6a7   : > { %v845_v38 = vmul.f32 0.5, %v844_v37 }
 0x6a9   : > { %v846_v33 = vsub.f32 1.5, %v845_v38 }
 0x6ab   : > { %v847_v39 = vmul.f32 %v1007_v35, %v846_v33 }
 0x6ad   : > { %v851_v43 = vsel %vm850_vm9, %v1007_v35, %v847_v39 }
 0x6ae   : > { %v852_v44 = vmul.f32 %v851_v43, %v840_v40 }
 0x6b0   : > { %v854_v45 = vmul.f32 %v853_v42, %v852_v44 }
 0x6b2   : > { %v856_v46 = vadd.f32 %v855_v41, %v854_v45 }
 0x6b4   : > { %v866_v47 = vrot.slane %v856_v46, 6  ;;  %v862_v48 = vrot.slane %v856_v46, 4  ;;  %v858_v49 = vrot.slane %v856_v46, 2 }
 0x6b6   : > { %867 = vrot.lane.b32.xlu0 %v866_v47, %s1017_s27  ;;  %863 = vrot.lane.b32.xlu2 %v862_v48, %s1018_s12 }
 0x6b7   : > { %859 = vrot.lane.b32.xlu1 %v858_v49, %s1019_s13 }
 0x710   : > { %v864_v51 = vpop.permute.xlu2 %863 }
 0x728   : > { %v868_v52 = vpop.permute.xlu0 %867 }
 0x729   : > { %v860_v50 = vpop.permute.xlu1 %859 }
 0x72a   : > { %v870_v24 = vsel %vm428_vm0, %v856_v46, %v860_v50 }
 0x72b   : > { %v871_v53 = vsel %vm558_vm2, %v870_v24, %v864_v51 }
 0x72c   : > { %v873_v54 = vsel %vm872_vm10, %v871_v53, %v868_v52 }
 0x72d   : > { %874 = vst [vmem:[%s415_s19] sm:$0x3] %v873_v54 }
 0x72e PF: > { %s21_s17 = sadd.s32 1, %s1014_s17  }
 0x72f   : > { %p18_p4 = scmp.ge.s32.totalorder %s21_s17, 4  }
 0x731   :  { %20 = sbr.rel (!%p18_p4) target bundleno = 1 (0x1), region = 101 }

</bundles_post_ra>
